<compile_context>
chip_gen: v5e
topology: v5e:2x2
jax: 0.10.0
libtpu: 0.0.40
codegen_flags: <defaults>
</compile_context>

<pallas_src>
import jax
import jax.numpy as jnp
from jax.experimental import pallas as pl
from jax.experimental.pallas import tpu as pltpu

PADDING_ID = 58100  # default padding_id of the torch module


# ----------------------------------------------------------------------------
# Pallas kernel: fused embedding-gather + LayerNorm(x @ W + b)
# ----------------------------------------------------------------------------
def _last_state_kernel(ids_ref, emb_ref, w_ref, b_ref, o_ref):
    ids = ids_ref[...]                                   # (tn, 1) int32
    tn = ids.shape[0]
    vocab = emb_ref.shape[0]

    # Embedding gather as a one-hot matmul on the MXU (exact for bf16 table).
    onehot = (jax.lax.broadcasted_iota(jnp.int32, (tn, vocab), 1) == ids
              ).astype(jnp.bfloat16)                     # (tn, V)
    x = jnp.dot(onehot, emb_ref[...],
                preferred_element_type=jnp.float32).astype(jnp.bfloat16)

    # Projection: bf16 operands (no in-kernel casts), f32 accumulation.
    h = jnp.dot(x, w_ref[...], preferred_element_type=jnp.float32) + b_ref[...]

    # LayerNorm (no affine): f32 elementwise math, one-pass variance.
    # TODO(synk): switch to two-pass variance if real (non-synthetic) decoder
    # activations with large mean/spread ratio ever feed this.
    mu = jnp.mean(h, axis=-1, keepdims=True)
    var = jnp.mean(h * h, axis=-1, keepdims=True) - mu * mu
    inv = jax.lax.rsqrt(jnp.maximum(var, 0.0) + 1e-5)
    o_ref[...] = ((h - mu) * inv).astype(o_ref.dtype)


def _pick_tile(n, tile_n):
    """Pick a row-tile size: multiple of 8, and (when possible) an even number
    of tiles so both v7x TensorCores get work along the 'parallel' axis."""
    if n <= 8:
        return n
    if n <= tile_n:
        tn = ((n + 1) // 2 + 7) // 8 * 8       # ~half the rows, rounded to 8
        return min(tn, n)
    return tile_n


def last_state(dec_ids_flat, emb, w, b, *, tile_n=1024):
    """dec_ids_flat: (N,) int32 token ids (already in [0, vocab)),
    emb: (V, H) bf16, w: (H, H) bf16, b: (1, H) f32  ->  (N, H) f32.

    Tiles the token axis; the embedding table, W and b stay resident in VMEM
    across tiles.  The only per-tile HBM traffic is 4 bytes/row of ids in and
    4*H bytes/row of hidden state out.
    """
    n = dec_ids_flat.shape[0]
    vocab, hidden = emb.shape
    tn = _pick_tile(n, tile_n)
    grid = (pl.cdiv(n, tn),)
    ids2d = dec_ids_flat.reshape(n, 1).astype(jnp.int32)

    return pl.pallas_call(
        _last_state_kernel,
        out_shape=jax.ShapeDtypeStruct((n, hidden), jnp.float32),
        grid=grid,
        in_specs=[
            pl.BlockSpec((tn, 1), lambda i: (i, 0)),          # ids: tiled over N
            pl.BlockSpec((vocab, hidden), lambda i: (0, 0)),  # emb table: resident
            pl.BlockSpec((hidden, hidden), lambda i: (0, 0)), # weight: resident
            pl.BlockSpec((1, hidden), lambda i: (0, 0)),      # bias: resident
        ],
        out_specs=pl.BlockSpec((tn, hidden), lambda i: (i, 0)),
        compiler_params=pltpu.CompilerParams(
            dimension_semantics=("parallel",)),               # megacore on v7x
    )(ids2d, emb, w, b)


# ----------------------------------------------------------------------------
# Module-equivalent forward
# ----------------------------------------------------------------------------
def init_params(key, vocab=128, hidden=128):
    k1, k2 = jax.random.split(key, 2)
    scale = 1.0 / jnp.sqrt(hidden)
    return dict(
        emb_dec=(jax.random.normal(k1, (vocab, hidden), jnp.float32)
                 * scale).astype(jnp.bfloat16),
        w_dec=(jax.random.normal(k2, (hidden, hidden), jnp.float32)
               * scale).astype(jnp.bfloat16),
        b_dec=jnp.zeros((1, hidden), jnp.float32),
    )


def last_state_embedding(params, input_ids=None, attention_mask=None,
                         decoder_input_ids=None, labels=None):
    """Mirrors LastStateEmbedding.forward:
       returns (decoder_last_hidden_state, attention_mask_decoder)."""
    vocab, hidden = params["emb_dec"].shape
    B, S = decoder_input_ids.shape

    # input_ids / attention_mask accepted for signature parity with the torch
    # module but unused by the synthetic stand-in (the encoder side of the
    # wrapped model does not appear in the module's outputs).
    del input_ids, attention_mask

    # Clamp ids into the synthetic vocab (tiny (B,S) int op, XLA-fused).
    ids = (decoder_input_ids % vocab).reshape(B * S)

    dec_h = last_state(ids, params["emb_dec"], params["w_dec"],
                       params["b_dec"]).reshape(B, S, hidden)

    # (padding_id != labels).long() — plain JAX; int32 vs torch's int64.
    dec_mask = (labels != PADDING_ID).astype(jnp.int32)

    return dec_h, dec_mask


# ----------------------------------------------------------------------------
if __name__ == "__main__":
    key = jax.random.PRNGKey(0)
    k_par, k_in, k_dec, k_lab, k_pad = jax.random.split(key, 5)

    B, S, H, V = 2, 8, 128, 128   # H=V=128 -> lane-dense blocks everywhere
    params = init_params(k_par, vocab=V, hidden=H)

    input_ids = jax.random.randint(k_in, (B, S), 0, V, dtype=jnp.int32)
    decoder_input_ids = jax.random.randint(k_dec, (B, S), 0, V, dtype=jnp.int32)
    attention_mask = jnp.ones((B, S), jnp.int32)

    # labels: random ids with some positions set to the padding id
    base_labels = jax.random.randint(k_lab, (B, S), 0, V, dtype=jnp.int32)
    pad_positions = jax.random.bernoulli(k_pad, 0.3, (B, S))
    labels = jnp.where(pad_positions, jnp.int32(PADDING_ID), base_labels)

    dec_h, dec_mask = last_state_embedding(
        params, input_ids=input_ids, attention_mask=attention_mask,
        decoder_input_ids=decoder_input_ids, labels=labels)
    jax.block_until_ready((dec_h, dec_mask))

    # sanity checks ----------------------------------------------------------
    assert dec_h.shape == (B, S, H) and dec_h.dtype == jnp.float32
    assert dec_mask.shape == (B, S) and dec_mask.dtype == jnp.int32

    # plain-JAX reference with the same bf16-MXU / f32-accumulate math
    x = params["emb_dec"][(decoder_input_ids % V).reshape(-1)]        # bf16 (N,H)
    h = jnp.dot(x, params["w_dec"],
                preferred_element_type=jnp.float32) + params["b_dec"]
    mu = jnp.mean(h, axis=-1, keepdims=True)
    var = jnp.mean(h * h, axis=-1, keepdims=True) - mu * mu
    ref = ((h - mu) * jax.lax.rsqrt(jnp.maximum(var, 0.0) + 1e-5))
    ref = ref.reshape(B, S, H)

    assert bool(jnp.allclose(dec_h, ref, atol=2e-3, rtol=2e-3))
    expected_mask = (labels != PADDING_ID).astype(jnp.int32)
    assert bool(jnp.all(dec_mask == expected_mask))

    print("KERNEL_OK")
</pallas_src>

<mosaic_0001>
module attributes {stable_mosaic.version = 11 : i64} {
  func.func @_last_state_kernel(%arg0: i32, %arg1: memref<8x1xi32, #tpu.memory_space<vmem>>, %arg2: memref<128x128xbf16, #tpu.memory_space<vmem>>, %arg3: memref<128x128xbf16, #tpu.memory_space<vmem>>, %arg4: memref<1x128xf32, #tpu.memory_space<vmem>>, %arg5: memref<8x128xf32, #tpu.memory_space<vmem>>) attributes {dimension_semantics = [#tpu.dimension_semantics<parallel>], iteration_bounds = array<i64: 2>, scalar_prefetch = 0 : i64, scratch_operands = 0 : i64, tpu.core_type = #tpu.core_type<tc>, window_params = [{transform_indices = @transform_0, window_bounds = array<i64: 8, 1>}, {pipeline_mode = #tpu.pipeline_mode<synchronous>, transform_indices = @transform_1, window_bounds = array<i64: 128, 128>}, {pipeline_mode = #tpu.pipeline_mode<synchronous>, transform_indices = @transform_2, window_bounds = array<i64: 128, 128>}, {pipeline_mode = #tpu.pipeline_mode<synchronous>, transform_indices = @transform_3, window_bounds = array<i64: 1, 128>}, {transform_indices = @transform_4, window_bounds = array<i64: 8, 128>}]} {
    %c0 = arith.constant 0 : index
    %c0_0 = arith.constant 0 : index
    %0 = vector.load %arg1[%c0, %c0_0] : memref<8x1xi32, #tpu.memory_space<vmem>>, vector<8x1xi32>
    %1 = tpu.iota {dimensions = array<i32: 1>} : vector<8x128xi32>
    %2 = vector.broadcast %0 : vector<8x1xi32> to vector<8x128xi32>
    %3 = arith.cmpi eq, %1, %2 : vector<8x128xi32>
    %4 = arith.extui %3 : vector<8x128xi1> to vector<8x128xi32>
    %5 = arith.sitofp %4 : vector<8x128xi32> to vector<8x128xf32>
    %6 = arith.truncf %5 : vector<8x128xf32> to vector<8x128xbf16>
    %c0_1 = arith.constant 0 : index
    %c0_2 = arith.constant 0 : index
    %7 = vector.load %arg2[%c0_1, %c0_2] : memref<128x128xbf16, #tpu.memory_space<vmem>>, vector<128x128xbf16>
    %cst = arith.constant dense<0.000000e+00> : vector<8x128xf32>
    %8 = tpu.matmul %6, %7, %cst {dimension_numbers = #tpu.dot_dimension_numbers<[1], [0], [0], [1], [0, 0, 1, 1], [], []>} : vector<8x128xbf16>, vector<128x128xbf16>, vector<8x128xf32> -> vector<8x128xf32>
    %9 = arith.truncf %8 : vector<8x128xf32> to vector<8x128xbf16>
    %c0_3 = arith.constant 0 : index
    %c0_4 = arith.constant 0 : index
    %10 = vector.load %arg3[%c0_3, %c0_4] : memref<128x128xbf16, #tpu.memory_space<vmem>>, vector<128x128xbf16>
    %cst_5 = arith.constant dense<0.000000e+00> : vector<8x128xf32>
    %11 = tpu.matmul %9, %10, %cst_5 {dimension_numbers = #tpu.dot_dimension_numbers<[1], [0], [0], [1], [0, 0, 1, 1], [], []>} : vector<8x128xbf16>, vector<128x128xbf16>, vector<8x128xf32> -> vector<8x128xf32>
    %c0_6 = arith.constant 0 : index
    %c0_7 = arith.constant 0 : index
    %12 = vector.load %arg4[%c0_6, %c0_7] : memref<1x128xf32, #tpu.memory_space<vmem>>, vector<1x128xf32>
    %13 = vector.broadcast %12 : vector<1x128xf32> to vector<8x128xf32>
    %14 = arith.addf %11, %13 : vector<8x128xf32>
    %cst_8 = arith.constant dense<0.000000e+00> : vector<8xf32>
    %15 = vector.multi_reduction <add>, %14, %cst_8 [1] : vector<8x128xf32> to vector<8xf32>
    %16 = vector.shape_cast %15 : vector<8xf32> to vector<8x1xf32>
    %cst_9 = arith.constant 1.280000e+02 : f32
    %17 = vector.broadcast %cst_9 : f32 to vector<8x1xf32>
    %18 = arith.divf %16, %17 : vector<8x1xf32>
    %19 = arith.mulf %14, %14 : vector<8x128xf32>
    %cst_10 = arith.constant dense<0.000000e+00> : vector<8xf32>
    %20 = vector.multi_reduction <add>, %19, %cst_10 [1] : vector<8x128xf32> to vector<8xf32>
    %21 = vector.shape_cast %20 : vector<8xf32> to vector<8x1xf32>
    %cst_11 = arith.constant 1.280000e+02 : f32
    %22 = vector.broadcast %cst_11 : f32 to vector<8x1xf32>
    %23 = arith.divf %21, %22 : vector<8x1xf32>
    %24 = arith.mulf %18, %18 : vector<8x1xf32>
    %25 = arith.subf %23, %24 : vector<8x1xf32>
    %cst_12 = arith.constant 0.000000e+00 : f32
    %26 = vector.broadcast %cst_12 : f32 to vector<8x1xf32>
    %27 = arith.maximumf %25, %26 : vector<8x1xf32>
    %cst_13 = arith.constant 9.99999974E-6 : f32
    %28 = vector.broadcast %cst_13 : f32 to vector<8x1xf32>
    %29 = arith.addf %27, %28 : vector<8x1xf32>
    %30 = math.rsqrt %29 : vector<8x1xf32>
    %31 = vector.broadcast %18 : vector<8x1xf32> to vector<8x128xf32>
    %32 = arith.subf %14, %31 : vector<8x128xf32>
    %33 = vector.broadcast %30 : vector<8x1xf32> to vector<8x128xf32>
    %34 = arith.mulf %32, %33 : vector<8x128xf32>
    %c0_14 = arith.constant 0 : index
    %c0_15 = arith.constant 0 : index
    %35 = vector.load %arg5[%c0_14, %c0_15] : memref<8x128xf32, #tpu.memory_space<vmem>>, vector<8x128xf32>
    tpu.vector_store %arg5[%c0_14, %c0_15], %34 {strides = array<i32>} : memref<8x128xf32, #tpu.memory_space<vmem>>, vector<8x128xf32>,
    return
  }
  func.func @transform_0(%arg0: i32) -> (i32, i32) {
    %c0_i32 = arith.constant 0 : i32
    %c0_i32_0 = arith.constant 0 : i32
    return %arg0, %c0_i32 : i32, i32
  }
  func.func @transform_1(%arg0: i32) -> (i32, i32) {
    %c0_i32 = arith.constant 0 : i32
    %c0_i32_0 = arith.constant 0 : i32
    %c0_i32_1 = arith.constant 0 : i32
    return %c0_i32, %c0_i32_0 : i32, i32
  }
  func.func @transform_2(%arg0: i32) -> (i32, i32) {
    %c0_i32 = arith.constant 0 : i32
    %c0_i32_0 = arith.constant 0 : i32
    %c0_i32_1 = arith.constant 0 : i32
    return %c0_i32, %c0_i32_0 : i32, i32
  }
  func.func @transform_3(%arg0: i32) -> (i32, i32) {
    %c0_i32 = arith.constant 0 : i32
    %c0_i32_0 = arith.constant 0 : i32
    %c0_i32_1 = arith.constant 0 : i32
    return %c0_i32, %c0_i32_0 : i32, i32
  }
  func.func @transform_4(%arg0: i32) -> (i32, i32) {
    %c0_i32 = arith.constant 0 : i32
    %c0_i32_0 = arith.constant 0 : i32
    return %arg0, %c0_i32 : i32, i32
  }
}

</mosaic_0001>

<bundles_post_ra>
// kernel: tpu_custom_call.1
= control target key start
LH: loop header
LB: loop body
LE: loop exit
PB: predicated region body
PF: predicated region fallthrough
CT: control target
= control target key end

     0   :  { %9 = vsyncpa [#allocation3], 0  ;;  %s969_s0 = inlined_call_operand.vmem [shape: s32[16,1], index: 0, kind: input, shape index: {}]   ;;  %s970_s1 = inlined_call_operand.hbm [shape: bf16[128,128], index: 1, kind: input, shape index: {}]   ;;  %s971_s2 = inlined_call_operand.hbm [shape: bf16[128,128], index: 2, kind: input, shape index: {}]   ;;  %s972_s3 = inlined_call_operand.vmem [shape: f32[1,128], index: 3, kind: input, shape index: {}]   ;;  %s973_s4 = inlined_call_operand.hbm [shape: f32[16,128], index: 4, kind: output, shape index: {}]  }
   0x1   :  { %10 = vsyncpa [#allocation6], 0 }
   0x2   :  { %11 = vsyncpa [#allocation4], 0 }
   0x3   :  { %13 = vsyncpa [#allocation4 + $0x1], 0  ;;  %s856_s15 = smov 0   ;;  %s858_s16 = smov 0  }
   0x4   :  { %s860_s17 = smov 0   ;;  %s862_s18 = smov 0  }
   0x5 LB: > { %s877_s19 = sadd.s32 4294967295, %s822_s18   ;;  %s524_s20 = sadd.s32 4294967294, %s822_s18   ;;  %s822_s18 = sphi %s862_s18, %s980_s18   ;;  %s818_s17 = sphi %s860_s17, %s979_s17   ;;  %s814_s16 = sphi %s858_s16, %s978_s16   ;;  %s810_s15 = sphi %s856_s15, %s977_s15  }
   0x6   : > { %s881_s21 = sadd.s32 1, %s822_s18   ;;  %s115_s22 = sadd.s32 1, %s818_s17 }
   0x7   : > { %s112_s23 = ssub.s32 %s822_s18, %s881_s21  ;;  %p125_p0 = scmp.ne.s32.totalorder %s818_s17, %s814_s16 }
   0x8   : > { %p113_p1 = scmp.eq.s32.totalorder %s112_s23, 0  ;;  %p126_p2 = scmp.eq.s32.totalorder %s877_s19, 1 }
   0x9   : > { %p131_p3 = scmp.ne.s32.totalorder %s814_s16, %s810_s15  ;;  %p132_p4 = scmp.eq.s32.totalorder %s524_s20, 1 }
   0xa   : > { %s892_s24 = scalar_select %p113_p1, %s818_s17, %s115_s22  }
   0xb   : > { %p894_p5 = por %p126_p2, %p125_p0  ;;  %p898_p6 = por %p132_p4, %p131_p3 }
   0xc   : > { %p525_p7 = scmp.ge.s32.totalorder %s822_s18, 1  ;;  %p139_p8 = scmp.lt.s32.totalorder %s822_s18, 3 }
   0xd   : > { %p642_p9 = scmp.eq.s32.totalorder %s877_s19, 0  ;;  %s150_s30 = sshll.u32 %s970_s1, 4  ;;  %s151_s30 = int_to_ptr.hbm [resolvable:$true] %s150_s30 }
   0xe   : > { %p905_p10 = pnand %p525_p7, %p139_p8  ;;  %s824_s5 = smov [#allocation2]  }
   0xf   : > { %s152_s6 = sshll.u32 %s824_s5, 4  ;;  %s164_s9 = sshll.u32 %s971_s2, 4  ;;  %s153_s6 = int_to_ptr.vmem [resolvable:$true] %s152_s6  ;;  %s165_s9 = int_to_ptr.hbm [resolvable:$true] %s164_s9 }
  0x10   : > { %p631_p11 = pneg %p905_p10  ;;  %s825_s10 = smov 64  }
  0x11   : > { %s826_s11 = smov 4   ;;  %s827_s12 = smov [#allocation5]  }
  0x12   : > { %p632_p12 = pnand %p642_p9, %p631_p11  ;;  %s166_s13 = sshll.u32 %s827_s12, 4  ;;  %s167_s13 = int_to_ptr.vmem [resolvable:$true] %s166_s13 }
  0x13   : > { %192 = sbr.rel (%p905_p10) target bundleno = 556 (0x22c), region = 36 }
  0x14   : > { %634 = dma.hbm_to_vmem [thread:$0]  (!%p632_p12), %s151_s30, 1024, %s153_s6, [#allocation3], %s825_s10, %s825_s10, %s826_s11  }
  0x15   : > { %637 = dma.hbm_to_vmem [thread:$0]  (!%p632_p12), %s165_s9, 1024, %s167_s13, [#allocation6], %s825_s10, %s825_s10, %s826_s11  }
  0x18   : > { %797 = dma.done.wait (%p642_p9), [#allocation3], 1024  }
  0x19   : > { %799 = vsyncadd (%p642_p9), [#allocation3], 4294966272 }
  0x1a   : > { %801 = dma.done.wait (%p642_p9), [#allocation6], 1024  }
  0x1b   : > { %803 = vsyncadd (%p642_p9), [#allocation6], 4294966272  ;;  %p223_p13 = scmp.lt.s32.totalorder %s877_s19, 1  ;;  %v828_v0 = vmov 0   ;;  %v612_v2 = vld [vmem:[#allocation2 + $0x38] sm:$0xff]  ;;  %v611_v3 = vld [vmem:[#allocation2 + $0x30] sm:$0xff]  ;;  %v228_v16 = vlaneseq }
  0x1c   : > { %686 = vset.pattern.permute.xlu0 %v828_v0  ;;  %301 = vmatpush.bf16.msra.mxu0 %v612_v2  ;;  %v610_v4 = vld [vmem:[#allocation2 + $0x28] sm:$0xff]  ;;  %v609_v5 = vld [vmem:[#allocation2 + $0x20] sm:$0xff]  ;;  %v608_v6 = vld [vmem:[#allocation2 + $0x18] sm:$0xff]  ;;  %v829_v20 = vmov 1.0|1.0   ;;  %v830_v30 = vmov 128.0  }
  0x1d   : > { %s224_s14 = scalar_select %p223_p13, %s877_s19, 1  ;;  %v607_v7 = vld [vmem:[#allocation2 + $0x10] sm:$0xff]  ;;  %v606_v8 = vld [vmem:[#allocation2 + $0x8] sm:$0xff]  ;;  %v605_v9 = vld [vmem:[#allocation2] sm:$0xff]  ;;  %v229_v18 = vand.u32 127, %v228_v16  ;;  %688 = vrcp.f32 %v830_v30 }
  0x1e   : > { %v620_v10 = vld [vmem:[#allocation5 + $0x38] sm:$0xff]  ;;  %v619_v11 = vld [vmem:[#allocation5 + $0x30] sm:$0xff]  ;;  %v618_v12 = vld [vmem:[#allocation5 + $0x28] sm:$0xff]  ;;  %s220_s30 = sand.u32 1, %s814_s16   ;;  %s602_s6 = sshll.u32 %s877_s19, 3 }
  0x1f   : > { %s533_s20 = sshll.u32 %s224_s14, 3  ;;  %383 = vmatpush.bf16.msra.mxu1 %v620_v10  ;;  %v617_v13 = vld [vmem:[#allocation5 + $0x20] sm:$0xff]  ;;  %v616_v14 = vld [vmem:[#allocation5 + $0x18] sm:$0xff]  ;;  %v615_v15 = vld [vmem:[#allocation5 + $0x10] sm:$0xff]  ;;  %s532_s5 = sshll.u32 %s220_s30, 3 }
  0x20   : > { %s226_s27 = scalar_lea.vmem %s969_s0, %s533_s20  ;;  %302 = vmatpush.bf16.msra.mxu0 %v611_v3  ;;  %v614_v17 = vld [vmem:[#allocation5 + $0x8] sm:$0xff]  ;;  %v613_v21 = vld [vmem:[#allocation5] sm:$0xff]  ;;  %s438_s9 = scalar_lea.hbm %s973_s4, %s602_s6 }
  0x21   : > { %v227_v1 = vld [vmem:[%s226_s27] sm:$0xff]  ;;  %s222_s10 = scalar_lea.vmem [#allocation7], %s532_s5  ;;  %s442_s12 = sshll.u32 %s438_s9, 4  ;;  %s443_s12 = int_to_ptr.hbm [resolvable:$true] %s442_s12 }
  0x22   : > { %231 = vperm.xlu0 %686, %v227_v1   ;;  %v687_v25 = vld [vmem:[%s972_s3] ss:$0 sm:$0xff]  ;;  %s440_s11 = sshll.u32 %s222_s10, 4  ;;  %s428_s19 = scalar_lea.sflag [#allocation4], %s220_s30  ;;  %s441_s11 = int_to_ptr.vmem [resolvable:$true] %s440_s11 }
  0x23   : > { %384 = vmatpush.bf16.msra.mxu1 %v619_v11  ;;  %v689_v31 = vpop.eup %688  ;;  %s766_s13 = sshra.s32 %s443_s12, 4  ;;  %s772_s23 = scalar_lea.hbm %s973_s4, 16  ;;  %s767_s13 = int_to_ptr.hbm [resolvable:$true] %s766_s13 }
  0x24   : > { %303 = vmatpush.bf16.msra.mxu0 %v610_v4  ;;  %v399_v32 = vmul.f32 128.0, %v689_v31  ;;  %vm403_vm2 = vweird.f32 %v689_v31  ;;  %s768_s14 = scalar_lea.hbm %s767_s13, 8  ;;  %p773_p3 = scmp.lt.s32.totalorder %s767_s13, %s973_s4 }
  0x25   : > { %p769_p0 = scmp.ne.s32.totalorder %s767_s13, %s768_s14  ;;  %p774_p4 = scmp.lt.s32.totalorder %s772_s23, %s768_s14 }
  0x26   : > { %v400_v33 = vsub.f32 1.0, %v399_v32 }
  0x27   : > { %385 = vmatpush.bf16.msra.mxu1 %v618_v12  ;;  %p770_p1 = pnand %p769_p0, %p894_p5  ;;  %p775_p7 = por %p774_p4, %p773_p3 }
  0x28   : > { %304 = vmatpush.bf16.msra.mxu0 %v609_v5  ;;  %v401_v34 = vmul.f32 %v689_v31, %v400_v33 }
  0x29   : > { %p771_p2 = pneg %p770_p1 }
  0x2a   : > { %v402_v35 = vadd.f32 %v689_v31, %v401_v34 }
  0x2b   : > { %386 = vmatpush.bf16.msra.mxu1 %v617_v13  ;;  %p776_p8 = pnand %p775_p7, %p771_p2 }
  0x2c   : > { %305 = vmatpush.bf16.msra.mxu0 %v608_v6  ;;  %v404_v36 = vsel %vm403_vm2, %v689_v31, %v402_v35 }
  0x2f   : > { %387 = vmatpush.bf16.msra.mxu1 %v616_v14 }
  0x30   : > { %306 = vmatpush.bf16.msra.mxu0 %v607_v7 }
  0x33   : > { %388 = vmatpush.bf16.msra.mxu1 %v615_v15 }
  0x34   : > { %307 = vmatpush.bf16.msra.mxu0 %v606_v8 }
  0x37   : > { %389 = vmatpush.bf16.msra.mxu1 %v614_v17 }
  0x38   : > { %308 = vmatpush.bf16.msra.mxu0 %v605_v9 }
  0x3b   : > { %390 = vmatpush.bf16.msra.mxu1 %v613_v21 }
  0x94   : > { %v232_v19 = vpop.permute.xlu0 %231 }
  0x95   : > { %vm233_vm0 = vcmp.eq.s32.totalorder %v229_v18, %v232_v19 }
  0x96   : > { %vm567_vm1 = vmpackc.low %vm233_vm0, %vm233_vm0 }
  0x97   : > { %568 = vmatmul.msk.bf16.vlgmr.msra.gmra.mxu0 %vm567_vm1, %v829_v20 }
 0x114   : > { %v310_v22 = vpop.f32.mrf.mxu0 }
 0x115   : > { %v314_v23 = vpack.c.bf16 %v310_v22, %v310_v22 }
 0x117   : > { %391 = vmatmul.bf16.vlgmr.msra.gmra.mxu1 %v314_v23 }
 0x11c   : > { %v312_v24 = vpop.f32.mrf.mxu0 }
 0x194   : > { %v392_v26 = vpop.f32.mrf.mxu1 }
 0x195   : > { %v393_v27 = vadd.f32 %v687_v25, %v392_v26 }
 0x197   : > { %396 = vadd.xlane.f32.xlu0 %v393_v27  ;;  %v406_v28 = vmul.f32 %v393_v27, %v393_v27 }
 0x199   : > { %407 = vadd.xlane.f32.xlu1 %v406_v28 }
 0x19c   : > { %v394_v29 = vpop.f32.mrf.mxu1 }
 0x20a   : > { %v397_v37 = vpop.xlane.xlu0 %396 }
 0x20b   : > { %v405_v38 = vmul.f32 %v404_v36, %v397_v37 }
 0x20c   : > { %v408_v39 = vpop.xlane.xlu1 %407 }
 0x20d   : > { %v410_v40 = vmul.f32 %v405_v38, %v405_v38  ;;  %v409_v41 = vmul.f32 %v408_v39, %v404_v36  ;;  %v424_v51 = vsub.f32 %v393_v27, %v405_v38 }
 0x20f   : > { %v411_v42 = vsub.f32 %v409_v41, %v410_v40 }
 0x211   : > { %v412_v43 = vmax.f32 %v411_v42, 0.0 }
 0x213   : > { %v413_v44 = vadd.f32 1e-05, %v412_v43 }
 0x215   : > { %690 = vrsqrt.f32 %v413_v44  ;;  %vm420_vm4 = vweird.f32 %v413_v44 }
 0x21b   : > { %v691_v45 = vpop.eup %690 }
 0x21c   : > { %v415_v46 = vmul.f32 %v691_v45, %v413_v44  ;;  %vm421_vm3 = vweird.f32 %v691_v45 }
 0x21d   : > { %vm422_vm5 = vmor %vm420_vm4, %vm421_vm3 }
 0x21e   : > { %v416_v47 = vmul.f32 %v691_v45, %v415_v46 }
 0x220   : > { %v417_v48 = vmul.f32 0.5, %v416_v47 }
 0x222   : > { %v418_v49 = vsub.f32 1.5, %v417_v48 }
 0x224   : > { %v419_v50 = vmul.f32 %v691_v45, %v418_v49 }
 0x226   : > { %v423_v52 = vsel %vm422_vm5, %v691_v45, %v419_v50 }
 0x227   : > { %v425_v53 = vmul.f32 %v424_v51, %v423_v52 }
 0x229   : > { %426 = vst [vmem:[%s222_s10] sm:$0xff] %v425_v53 }
 0x22a   : > { %779 = shalt.err (!%p776_p8)
}
 0x22b   : > { %629 = dma.vmem_to_hbm [thread:$0]  (%p894_p5), %s441_s11, 128, %s443_s12, %s428_s19  }
 0x22c PF: > { %p646_p9 = scmp.ge.s32.totalorder %s822_s18, 2  ;;  %s454_s29 = sand.u32 1, %s810_s15  }
 0x22d   : > { %s455_s30 = scalar_lea.sflag [#allocation4], %s454_s29 }
 0x22e   : > { %p639_p10 = pnand %p646_p9, %p898_p6 }
 0x230   : > { %p640_p11 = pneg %p639_p10 }
 0x232   : > { %805 = dma.done.wait (%p640_p11), %s455_s30, 128  }
 0x233   : > { %807 = vsyncadd (%p640_p11), %s455_s30, 4294967168  ;;  %p16_p12 = scmp.ge.s32.totalorder %s881_s21, 4   ;;  %s977_s15 = smov %s814_s16 }
 0x234   : > { %s978_s16 = smov %s818_s17  ;;  %s979_s17 = smov %s892_s24 }
 0x235   : > { %s980_s18 = smov %s881_s21  ;;  %18 = sbr.rel (!%p16_p12) target bundleno = 5 (0x5), region = 80 }
 0x23a   :  { %461 = vsyncpa [#allocation3], 1 }
 0x23b   :  { %463 = vsyncpa [#allocation3 + $0x1], 1 }
 0x23c   :  { %464 = vsyncpa [#allocation6], 1 }
 0x23d   :  { %465 = vsyncpa [#allocation4], 1 }
 0x23e   :  { %467 = vsyncpa [#allocation4 + $0x1], 1 }

</bundles_post_ra>
